<compile_context>
chip_gen: v7x
topology: tpu7x:2x2x1
jax: 0.10.0
libtpu: 0.0.40
codegen_flags: <defaults>
</compile_context>

<pallas_src>
import functools

import jax
import jax.numpy as jnp
from jax.experimental import pallas as pl
from jax.experimental.pallas import tpu as pltpu

# ------------------------- model config -----------------------------------
CFG = {
    'VGG11': [[64, 'M'], [128, 'M'], [256, 256, 'M'], [512, 512, 'M'], [512, 512, 'M']],
    'VGG13': [[64, 64, 'M'], [128, 128, 'M'], [256, 256, 'M'], [512, 512, 'M'], [512, 512, 'M']],
    'VGG16': [[64, 64, 'M'], [128, 128, 'M'], [256, 256, 256, 'M'], [512, 512, 512, 'M'], [512, 512, 512, 'M']],
    'VGG19': [[64, 64, 'M'], [128, 128, 'M'], [256, 256, 256, 256, 'M'], [512, 512, 512, 512, 'M'], [512, 512, 512, 512, 'M']],
}

MEAN = jnp.array([0.4914, 0.4822, 0.4465], jnp.float32)
STD = jnp.array([0.2023, 0.1994, 0.201], jnp.float32)

UP = 8.0      # MyFloor "up"
TQ = 32.0     # MyFloor quantization steps "t"
BN_EPS = 1e-5

ACT_DTYPE = jnp.bfloat16   # streamed activations; weights stream as int8


def _round_up(x, m):
    return (x + m - 1) // m * m


def _vmem_limit_bytes():
    # v7x has only 64 MiB physical VMEM per TensorCore; v5e/v6e have 128 MiB.
    try:
        cap = int(pltpu.get_tpu_info().vmem_capacity_bytes)
    except Exception:
        cap = 64 * 1024 * 1024
    return max(32 * 1024 * 1024, min(cap - 16 * 1024 * 1024, 100 * 1024 * 1024))


def _num_tensorcores():
    """Best-effort TensorCores-per-device query (v4/v5p/v7x: 2, v5e/v6e: 1)."""
    try:
        d = jax.devices()[0]
        for name in ("num_cores", "core_count"):
            v = getattr(d, name, None)
            if isinstance(v, int) and v > 0:
                return v
        kind = str(getattr(d, "device_kind", "")).lower()
        if any(tok in kind for tok in ("v2", "v3", "v5e", "v5 lite", "v5lite", "v6")):
            return 1
    except Exception:
        pass
    return 2   # conservative default: assume a megacore part


_VMEM_LIMIT = _vmem_limit_bytes()
_NCORES = _num_tensorcores()
# int8 FC weight tile + its in-kernel f32 dequant must fit the scoped budget.
_FC_TILE_N = 2048 if _VMEM_LIMIT >= 80 * 1024 * 1024 else 1024

_CPARAMS = pltpu.CompilerParams(dimension_semantics=("parallel",),
                                vmem_limit_bytes=_VMEM_LIMIT)


def _myfloor(y):
    # MyFloor: clamp(floor(x * t / up + 0.5) / t, 0, 1) * up    (f32 math)
    return jnp.clip(jnp.floor(y * (TQ / UP) + 0.5) / TQ, 0.0, 1.0) * UP


def _pool2x2(y, bt, H, W, ct):
    """AvgPool2d(2,2) on an in-register (bt,H,W,ct) f32 tensor."""
    y = y.reshape(bt, H // 2, 2, W, ct)
    y = y[:, :, 0] + y[:, :, 1]
    y = y.reshape(bt, H // 2, W // 2, 2, ct)
    return (y[:, :, :, 0] + y[:, :, :, 1]) * 0.25


# ------------------------- Pallas kernels ----------------------------------
def _conv_kx_kernel(x_ref, w_ref, s_ref, b_ref, o_ref, *, H, W, pool, apply_floor):
    """3x3 conv with kx taps packed into the lane dim (3 per-ky matmuls).

    x_ref: (bt, H+2, W, 3*Cin) bf16   w_ref: (3, 3*Cin, ct) int8
    s_ref: (1, ct) f32 dequant scale  b_ref: (1, ct) f32 folded bias
    o_ref: (bt, Ho, Wo, ct) bf16
    """
    bt = x_ref.shape[0]
    k3 = x_ref.shape[3]
    ct = o_ref.shape[3]

    def tap(ky):
        # static offset slice along H does not cross (8,128) tiles
        slab = x_ref[:, ky:ky + H, :, :].reshape(bt * H * W, k3)
        wk = w_ref[ky].astype(jnp.float32).astype(x_ref.dtype)    # i8 -> bf16
        return jnp.dot(slab, wk, preferred_element_type=jnp.float32)

    acc = tap(0) + tap(1) + tap(2)                   # f32 accumulation
    y = acc * s_ref[0, :] + b_ref[0, :]              # dequant + BN/conv bias
    if apply_floor:
        y = _myfloor(y)
    y = y.reshape(bt, H, W, ct)
    if pool:
        y = _pool2x2(y, bt, H, W, ct)
    o_ref[...] = y.astype(o_ref.dtype)


def _conv_im2col_kernel(x_ref, w_ref, s_ref, b_ref, o_ref, *, H, W, pool, apply_floor):
    """Full-im2col 3x3 conv: a single matmul over K = 9*Cin.

    x_ref: (bt*H*W, 9*Cin) bf16       w_ref: (9*Cin, ct) int8
    o_ref: (bt*Ho*Wo, ct) bf16
    """
    rows = x_ref.shape[0]
    bt = rows // (H * W)
    ct = o_ref.shape[1]
    wk = w_ref[...].astype(jnp.float32).astype(x_ref.dtype)       # i8 -> bf16
    y = jnp.dot(x_ref[...], wk, preferred_element_type=jnp.float32)
    y = y * s_ref[0, :] + b_ref[0, :]
    if apply_floor:
        y = _myfloor(y)
    if pool:
        y = _pool2x2(y.reshape(bt, H, W, ct), bt, H, W, ct)
        y = y.reshape(bt * (H // 2) * (W // 2), ct)
    o_ref[...] = y.astype(o_ref.dtype)


def _linear_kernel(x_ref, w_ref, s_ref, b_ref, o_ref, *, apply_floor):
    """y = x @ dequant(w) * scale + b for one output-column tile.

    M = T*N rows is tiny, so the matmul runs in f32 (one dequant pass only);
    the whole layer is weight-DMA bound either way.
    """
    w = w_ref[...].astype(jnp.float32)                            # i8 -> f32
    y = jnp.dot(x_ref[...].astype(jnp.float32), w,
                preferred_element_type=jnp.float32)
    y = y * s_ref[0, :] + b_ref[0, :]
    if apply_floor:
        y = _myfloor(y)
    o_ref[...] = y.astype(o_ref.dtype)


# ------------------------- wrappers -----------------------------------------
def _pick_bt(B, bytes_per_image, budget=8 * 1024 * 1024):
    """Images per grid step.  Only force >=2 grid steps when there are two
    TensorCores to feed (v4/v5p/v7x); on 1-core chips use the full batch."""
    bt = max(1, min(B, budget // max(bytes_per_image, 1)))
    if _NCORES >= 2 and B >= 2:
        bt = min(bt, max(1, B // 2))
    while B % bt:
        bt -= 1
    return bt


def conv_bn_floor_pool(x, wq, scale, shift, *, pool, im2col, apply_floor=True):
    """x: (B,H,W,Cin) NHWC bf16.
       wq: int8, (9*Cin, Cout) if im2col else (3, 3*Cin, Cout).
       scale/shift: (1, Cout) f32 (per-Cout dequant scale / folded bias)."""
    B, H, W, cin = x.shape
    cout = scale.shape[1]
    ho, wo = (H // 2, W // 2) if pool else (H, W)
    xp = jnp.pad(x, ((0, 0), (1, 1), (1, 1), (0, 0)))        # padding=1 (glue)

    # Cout-shard the big layers across TensorCores (disjoint weight halves).
    n_ct = 2 if (_NCORES >= 2 and cout >= 256 and (cout // 2) % 128 == 0) else 1
    ct = cout // n_ct

    if im2col:
        assert wq.shape == (9 * cin, cout)
        # channel index = (ky*3 + kx)*Cin + c, matching w.reshape(9*Cin, Cout)
        x9 = jnp.concatenate([xp[:, ky:ky + H, kx:kx + W, :]
                              for ky in range(3) for kx in range(3)], axis=-1)
        x9 = x9.reshape(B * H * W, 9 * cin)
        act_block = B * H * W * 9 * cin * x9.dtype.itemsize
        if n_ct > 1 and act_block > 12 * 1024 * 1024:
            n_ct, ct = 1, cout                      # huge-batch safety valve
        if n_ct > 1:
            bt = B
            grid = (n_ct,)
            x_spec = pl.BlockSpec((B * H * W, 9 * cin), lambda i: (0, 0))
            w_spec = pl.BlockSpec((9 * cin, ct), lambda i: (0, i))
            v_spec = pl.BlockSpec((1, ct), lambda i: (0, i))
            o_spec = pl.BlockSpec((B * ho * wo, ct), lambda i: (0, i))
        else:
            bt = _pick_bt(B, H * W * 9 * cin * x9.dtype.itemsize)
            if (bt * H * W) % 8:                    # keep row blocks aligned
                bt = B
            grid = (B // bt,)
            x_spec = pl.BlockSpec((bt * H * W, 9 * cin), lambda i: (i, 0))
            w_spec = pl.BlockSpec((9 * cin, ct), lambda i: (0, 0))
            v_spec = pl.BlockSpec((1, ct), lambda i: (0, 0))
            o_spec = pl.BlockSpec((bt * ho * wo, ct), lambda i: (i, 0))
        kern = functools.partial(_conv_im2col_kernel, H=H, W=W, pool=pool,
                                 apply_floor=apply_floor)
        out = pl.pallas_call(
            kern,
            out_shape=jax.ShapeDtypeStruct((B * ho * wo, cout), ACT_DTYPE),
            grid=grid,
            in_specs=[x_spec, w_spec, v_spec, v_spec],
            out_specs=o_spec,
            compiler_params=_CPARAMS,
        )(x9, wq, scale, shift)
        return out.reshape(B, ho, wo, cout)

    # ----- kx-packed path (3 per-ky matmuls) --------------------------------
    assert wq.shape == (3, 3 * cin, cout)
    k3 = 3 * cin
    # x3[..., kx*Cin + c] = xp[..., w+kx, c]
    x3 = jnp.concatenate([xp[:, :, kx:kx + W, :] for kx in range(3)], axis=-1)
    bytes_img = (H + 2) * _round_up(W, 8) * _round_up(k3, 128) * x3.dtype.itemsize
    if n_ct > 1 and B * bytes_img > 12 * 1024 * 1024:
        n_ct, ct = 1, cout                          # huge-batch safety valve
    if n_ct > 1:
        bt = B
        grid = (n_ct,)
        x_spec = pl.BlockSpec((B, H + 2, W, k3), lambda i: (0, 0, 0, 0))
        w_spec = pl.BlockSpec((3, k3, ct), lambda i: (0, 0, i))
        v_spec = pl.BlockSpec((1, ct), lambda i: (0, i))
        o_spec = pl.BlockSpec((B, ho, wo, ct), lambda i: (0, 0, 0, i))
    else:
        bt = _pick_bt(B, bytes_img)
        grid = (B // bt,)
        x_spec = pl.BlockSpec((bt, H + 2, W, k3), lambda i: (i, 0, 0, 0))
        w_spec = pl.BlockSpec((3, k3, cout), lambda i: (0, 0, 0))
        v_spec = pl.BlockSpec((1, cout), lambda i: (0, 0))
        o_spec = pl.BlockSpec((bt, ho, wo, cout), lambda i: (i, 0, 0, 0))
    kern = functools.partial(_conv_kx_kernel, H=H, W=W, pool=pool,
                             apply_floor=apply_floor)
    return pl.pallas_call(
        kern,
        out_shape=jax.ShapeDtypeStruct((B, ho, wo, cout), ACT_DTYPE),
        grid=grid,
        in_specs=[x_spec, w_spec, v_spec, v_spec],
        out_specs=o_spec,
        compiler_params=_CPARAMS,
    )(x3, wq, scale, shift)


def linear(x, wq, scale, b, *, apply_floor, out_dtype=ACT_DTYPE, tile_n=None):
    """x: (B,K) bf16, wq: (K,N) int8, scale/b: (1,N) f32."""
    B, K = x.shape
    N = wq.shape[1]
    tn = min(tile_n or _FC_TILE_N, N)
    while N % tn:
        tn //= 2
    kern = functools.partial(_linear_kernel, apply_floor=apply_floor)
    return pl.pallas_call(
        kern,
        out_shape=jax.ShapeDtypeStruct((B, N), out_dtype),
        grid=(N // tn,),
        in_specs=[
            pl.BlockSpec((B, K), lambda j: (0, 0)),
            pl.BlockSpec((K, tn), lambda j: (0, j)),
            pl.BlockSpec((1, tn), lambda j: (0, j)),
            pl.BlockSpec((1, tn), lambda j: (0, j)),
        ],
        out_specs=pl.BlockSpec((B, tn), lambda j: (0, j)),
        compiler_params=_CPARAMS,
    )(x, wq, scale, b)


# ------------------------- parameter init -----------------------------------
def _quantize_per_cout(w):
    """Symmetric per-Cout int8 quantization; returns (int8 weights, (1,Cout) scale)."""
    amax = jnp.max(jnp.abs(w.reshape(-1, w.shape[-1])), axis=0)
    scale = jnp.maximum(amax, 1e-6) / 127.0
    wq = jnp.clip(jnp.round(w / scale), -127.0, 127.0).astype(jnp.int8)
    return wq, scale.reshape(1, -1).astype(jnp.float32)


def init_params(key, vgg_name='VGG11', num_classes=10, img_hw=32):
    """Features: list of dicts {wq, scale, shift, pool, im2col, cin, cout}."""
    features = []
    cin, H = 3, img_hw
    for block in CFG[vgg_name]:
        for item in block:
            if item == 'M':
                # AvgPool2d(2,2) always follows a conv: fuse into its epilogue.
                features[-1]['pool'] = True
                H //= 2
            else:
                cout = int(item)
                key, k1, k2 = jax.random.split(key, 3)
                fan_out = cout * 9
                fan_in = cin * 9
                # kaiming_normal_(mode='fan_out', nonlinearity='relu')
                w = jax.random.normal(k1, (3, 3, cin, cout), jnp.float32) \
                    * jnp.sqrt(2.0 / fan_out)
                conv_b = jax.random.uniform(k2, (cout,), jnp.float32,
                                            -1.0, 1.0) / jnp.sqrt(fan_in)
                # eval-mode BN folded: gamma=1, beta=0, mean=0, var=1
                bn_scale = jnp.ones((cout,), jnp.float32) / jnp.sqrt(1.0 + BN_EPS)
                w = w * bn_scale.reshape(1, 1, 1, cout)
                shift = (conv_b * bn_scale).reshape(1, cout)
                # full im2col for the first conv (Cin=3) and small-spatial layers
                im2col = (cin == 3) or (H < 8)
                wq, scale = _quantize_per_cout(w)
                wq = wq.reshape(9 * cin, cout) if im2col \
                    else wq.reshape(3, 3 * cin, cout)
                features.append(dict(wq=wq, scale=scale, shift=shift,
                                     pool=False, im2col=im2col,
                                     cin=cin, cout=cout))
                cin = cout
    # classifier: Linear(512,4096)+MyFloor, Linear(4096,4096)+MyFloor,
    #             Linear(4096,num_classes)  (final layer lane-padded to 128)
    ncp = _round_up(num_classes, 128)
    fcs = []
    for din, dout, pad_to, fl in [(512, 4096, 4096, True),
                                  (4096, 4096, 4096, True),
                                  (4096, num_classes, ncp, False)]:
        key, k1 = jax.random.split(key)
        w = jax.random.normal(k1, (din, dout), jnp.float32) / jnp.sqrt(din)
        w = jnp.pad(w, ((0, 0), (0, pad_to - dout)))
        wq, scale = _quantize_per_cout(w)
        b = jnp.zeros((1, pad_to), jnp.float32)      # nn.init.zeros_(m.bias)
        fcs.append(dict(wq=wq, scale=scale, b=b, floor=fl))
    return features, fcs


# ------------------------- forward -------------------------------------------
def vgg_forward(features, fcs, x_nchw, T, num_classes):
    N = x_nchw.shape[0]
    # TensorNormalization (per-channel CIFAR mean/std) — glue elementwise
    x = (x_nchw - MEAN[None, :, None, None]) / STD[None, :, None, None]
    if T > 0:
        # add_dimention + MergeTemporalDim: [N,C,H,W] -> [T*N,C,H,W]
        x = jnp.tile(x, (T, 1, 1, 1))
    x = jnp.transpose(x, (0, 2, 3, 1)).astype(ACT_DTYPE)     # NCHW -> NHWC
    for lyr in features:
        x = conv_bn_floor_pool(x, lyr['wq'], lyr['scale'], lyr['shift'],
                               pool=lyr['pool'], im2col=lyr['im2col'])
    x = x.reshape(x.shape[0], -1)                            # Flatten (1x1 spatial)
    n_fc = len(fcs)
    for idx, lyr in enumerate(fcs):
        last = idx == n_fc - 1
        x = linear(x, lyr['wq'], lyr['scale'], lyr['b'], apply_floor=lyr['floor'],
                   out_dtype=jnp.float32 if last else ACT_DTYPE)
    x = x[:, :num_classes]                                   # undo lane padding
    if T > 0:
        x = x.reshape(T, N, num_classes)                     # ExpandTemporalDim
    return x


# ------------------------- conv self-check -----------------------------------
def _conv_ref(x, w, shift, pool):
    """Pure-JAX reference for the fused conv(+pool) kernels (no quantizer)."""
    B, H, W, _ = x.shape
    xp = jnp.pad(x.astype(jnp.float32), ((0, 0), (1, 1), (1, 1), (0, 0)))
    wf = w.astype(jnp.float32)
    out = jnp.zeros((B, H, W, w.shape[-1]), jnp.float32)
    for ky in range(3):
        for kx in range(3):
            out = out + jnp.einsum('bhwc,cd->bhwd',
                                   xp[:, ky:ky + H, kx:kx + W, :], wf[ky, kx])
    out = out + shift.reshape(1, 1, 1, -1)
    if pool:
        out = out.reshape(B, H // 2, 2, W // 2, 2, -1).mean(axis=(2, 4))
    return out


def _self_check_conv(key):
    k1, k2, k3, k4 = jax.random.split(key, 4)

    # path A: kx-packed, batch-parallel grid
    B, H, W, Cin, Cout = 2, 8, 8, 16, 64
    x = jax.random.normal(k1, (B, H, W, Cin), jnp.float32).astype(ACT_DTYPE)
    w = jax.random.normal(k2, (3, 3, Cin, Cout), jnp.float32) * 0.05
    shift = jnp.linspace(-0.1, 0.1, Cout, dtype=jnp.float32).reshape(1, Cout)
    wq, scale = _quantize_per_cout(w)
    wdq = wq.astype(jnp.float32) * scale.reshape(1, 1, 1, Cout)
    got = conv_bn_floor_pool(x, wq.reshape(3, 3 * Cin, Cout), scale, shift,
                             pool=True, im2col=False,
                             apply_floor=False).astype(jnp.float32)
    want = _conv_ref(x, wdq, shift, pool=True)
    err = float(jnp.max(jnp.abs(got - want)))
    assert err < 5e-2, f"kx-conv kernel mismatch: max abs err {err}"

    # path B: full im2col, Cout-sharded grid on 2-core chips
    B, H, W, Cin, Cout = 2, 4, 4, 32, 256
    x = jax.random.normal(k3, (B, H, W, Cin), jnp.float32).astype(ACT_DTYPE)
    w = jax.random.normal(k4, (3, 3, Cin, Cout), jnp.float32) * 0.05
    shift = jnp.linspace(-0.1, 0.1, Cout, dtype=jnp.float32).reshape(1, Cout)
    wq, scale = _quantize_per_cout(w)
    wdq = wq.astype(jnp.float32) * scale.reshape(1, 1, 1, Cout)
    got = conv_bn_floor_pool(x, wq.reshape(9 * Cin, Cout), scale, shift,
                             pool=True, im2col=True,
                             apply_floor=False).astype(jnp.float32)
    want = _conv_ref(x, wdq, shift, pool=True)
    err = float(jnp.max(jnp.abs(got - want)))
    assert err < 5e-2, f"im2col-conv kernel mismatch: max abs err {err}"


# ------------------------- demo ----------------------------------------------
if __name__ == "__main__":
    key = jax.random.PRNGKey(0)
    kp, kx, kc = jax.random.split(key, 3)

    # correctness guard for both conv kernel paths (incl. fused pool)
    _self_check_conv(kc)

    VGG_NAME = 'VGG11'
    T = 2
    NUM_CLASSES = 10
    BATCH = 2

    features, fcs = init_params(kp, VGG_NAME, NUM_CLASSES, img_hw=32)

    # CIFAR-like input (32x32 is required so the classifier sees 512 features)
    x = jax.random.uniform(kx, (BATCH, 3, 32, 32), jnp.float32)

    out = vgg_forward(features, fcs, x, T, NUM_CLASSES)
    out = jax.block_until_ready(out)

    assert out.shape == (T, BATCH, NUM_CLASSES), out.shape
    assert bool(jnp.all(jnp.isfinite(out)))
    print("KERNEL_OK")
</pallas_src>

<mosaic_0001>
module attributes {stable_mosaic.version = 11 : i64} {
  func.func @_conv_kx_kernel(%arg0: i32, %arg1: memref<1x10x8x48xbf16, #tpu.memory_space<vmem>>, %arg2: memref<3x48x64xi8, #tpu.memory_space<vmem>>, %arg3: memref<1x64xf32, #tpu.memory_space<vmem>>, %arg4: memref<1x64xf32, #tpu.memory_space<vmem>>, %arg5: memref<1x4x4x64xbf16, #tpu.memory_space<vmem>>) attributes {dimension_semantics = [#tpu.dimension_semantics<parallel>], iteration_bounds = array<i64: 2>, scalar_prefetch = 0 : i64, scratch_operands = 0 : i64, tpu.core_type = #tpu.core_type<tc>, window_params = [{transform_indices = @transform_0, window_bounds = array<i64: 1, 10, 8, 48>}, {pipeline_mode = #tpu.pipeline_mode<synchronous>, transform_indices = @transform_1, window_bounds = array<i64: 3, 48, 64>}, {pipeline_mode = #tpu.pipeline_mode<synchronous>, transform_indices = @transform_2, window_bounds = array<i64: 1, 64>}, {pipeline_mode = #tpu.pipeline_mode<synchronous>, transform_indices = @transform_3, window_bounds = array<i64: 1, 64>}, {transform_indices = @transform_4, window_bounds = array<i64: 1, 4, 4, 64>}]} {
    %c0 = arith.constant 0 : index
    %c0_0 = arith.constant 0 : index
    %c0_1 = arith.constant 0 : index
    %c0_2 = arith.constant 0 : index
    %0 = vector.load %arg1[%c0, %c0_0, %c0_1, %c0_2] : memref<1x10x8x48xbf16, #tpu.memory_space<vmem>>, vector<1x8x8x48xbf16>
    %1 = vector.shape_cast %0 : vector<1x8x8x48xbf16> to vector<64x48xbf16>
    %c0_3 = arith.constant 0 : index
    %c0_4 = arith.constant 0 : index
    %c0_5 = arith.constant 0 : index
    %2 = vector.load %arg2[%c0_3, %c0_4, %c0_5] : memref<3x48x64xi8, #tpu.memory_space<vmem>>, vector<1x48x64xi8>
    %3 = vector.shape_cast %2 : vector<1x48x64xi8> to vector<48x64xi8>
    %4 = arith.sitofp %3 : vector<48x64xi8> to vector<48x64xf32>
    %5 = arith.truncf %4 : vector<48x64xf32> to vector<48x64xbf16>
    %cst = arith.constant dense<0.000000e+00> : vector<64x64xf32>
    %6 = tpu.matmul %1, %5, %cst {dimension_numbers = #tpu.dot_dimension_numbers<[1], [0], [0], [1], [0, 0, 1, 1], [], []>} : vector<64x48xbf16>, vector<48x64xbf16>, vector<64x64xf32> -> vector<64x64xf32>
    %c0_6 = arith.constant 0 : index
    %c1 = arith.constant 1 : index
    %c0_7 = arith.constant 0 : index
    %c0_8 = arith.constant 0 : index
    %7 = vector.load %arg1[%c0_6, %c1, %c0_7, %c0_8] : memref<1x10x8x48xbf16, #tpu.memory_space<vmem>>, vector<1x8x8x48xbf16>
    %8 = vector.shape_cast %7 : vector<1x8x8x48xbf16> to vector<64x48xbf16>
    %c1_9 = arith.constant 1 : index
    %c0_10 = arith.constant 0 : index
    %c0_11 = arith.constant 0 : index
    %9 = vector.load %arg2[%c1_9, %c0_10, %c0_11] : memref<3x48x64xi8, #tpu.memory_space<vmem>>, vector<1x48x64xi8>
    %10 = vector.shape_cast %9 : vector<1x48x64xi8> to vector<48x64xi8>
    %11 = arith.sitofp %10 : vector<48x64xi8> to vector<48x64xf32>
    %12 = arith.truncf %11 : vector<48x64xf32> to vector<48x64xbf16>
    %cst_12 = arith.constant dense<0.000000e+00> : vector<64x64xf32>
    %13 = tpu.matmul %8, %12, %cst_12 {dimension_numbers = #tpu.dot_dimension_numbers<[1], [0], [0], [1], [0, 0, 1, 1], [], []>} : vector<64x48xbf16>, vector<48x64xbf16>, vector<64x64xf32> -> vector<64x64xf32>
    %14 = arith.addf %6, %13 : vector<64x64xf32>
    %c0_13 = arith.constant 0 : index
    %c2 = arith.constant 2 : index
    %c0_14 = arith.constant 0 : index
    %c0_15 = arith.constant 0 : index
    %15 = vector.load %arg1[%c0_13, %c2, %c0_14, %c0_15] : memref<1x10x8x48xbf16, #tpu.memory_space<vmem>>, vector<1x8x8x48xbf16>
    %16 = vector.shape_cast %15 : vector<1x8x8x48xbf16> to vector<64x48xbf16>
    %c2_16 = arith.constant 2 : index
    %c0_17 = arith.constant 0 : index
    %c0_18 = arith.constant 0 : index
    %17 = vector.load %arg2[%c2_16, %c0_17, %c0_18] : memref<3x48x64xi8, #tpu.memory_space<vmem>>, vector<1x48x64xi8>
    %18 = vector.shape_cast %17 : vector<1x48x64xi8> to vector<48x64xi8>
    %19 = arith.sitofp %18 : vector<48x64xi8> to vector<48x64xf32>
    %20 = arith.truncf %19 : vector<48x64xf32> to vector<48x64xbf16>
    %cst_19 = arith.constant dense<0.000000e+00> : vector<64x64xf32>
    %21 = tpu.matmul %16, %20, %cst_19 {dimension_numbers = #tpu.dot_dimension_numbers<[1], [0], [0], [1], [0, 0, 1, 1], [], []>} : vector<64x48xbf16>, vector<48x64xbf16>, vector<64x64xf32> -> vector<64x64xf32>
    %22 = arith.addf %14, %21 : vector<64x64xf32>
    %c0_20 = arith.constant 0 : index
    %c0_21 = arith.constant 0 : index
    %23 = vector.load %arg3[%c0_20, %c0_21] : memref<1x64xf32, #tpu.memory_space<vmem>>, vector<1x64xf32>
    %24 = vector.shape_cast %23 : vector<1x64xf32> to vector<64xf32>
    %25 = vector.shape_cast %24 : vector<64xf32> to vector<1x64xf32>
    %26 = vector.broadcast %25 : vector<1x64xf32> to vector<64x64xf32>
    %27 = arith.mulf %22, %26 : vector<64x64xf32>
    %c0_22 = arith.constant 0 : index
    %c0_23 = arith.constant 0 : index
    %28 = vector.load %arg4[%c0_22, %c0_23] : memref<1x64xf32, #tpu.memory_space<vmem>>, vector<1x64xf32>
    %29 = vector.shape_cast %28 : vector<1x64xf32> to vector<64xf32>
    %30 = vector.shape_cast %29 : vector<64xf32> to vector<1x64xf32>
    %31 = vector.broadcast %30 : vector<1x64xf32> to vector<64x64xf32>
    %32 = arith.addf %27, %31 : vector<64x64xf32>
    %33 = vector.shape_cast %32 : vector<64x64xf32> to vector<1x8x8x64xf32>
    %34 = vector.shape_cast %33 : vector<1x8x8x64xf32> to vector<1x4x2x8x64xf32>
    %35 = vector.extract_strided_slice %34 {offsets = [0, 0, 0, 0, 0], sizes = [1, 4, 1, 8, 64], strides = [1, 1, 1, 1, 1]} : vector<1x4x2x8x64xf32> to vector<1x4x1x8x64xf32>
    %36 = vector.shape_cast %35 : vector<1x4x1x8x64xf32> to vector<1x4x8x64xf32>
    %37 = vector.extract_strided_slice %34 {offsets = [0, 0, 1, 0, 0], sizes = [1, 4, 1, 8, 64], strides = [1, 1, 1, 1, 1]} : vector<1x4x2x8x64xf32> to vector<1x4x1x8x64xf32>
    %38 = vector.shape_cast %37 : vector<1x4x1x8x64xf32> to vector<1x4x8x64xf32>
    %39 = arith.addf %36, %38 : vector<1x4x8x64xf32>
    %40 = vector.shape_cast %39 : vector<1x4x8x64xf32> to vector<1x4x4x2x64xf32>
    %41 = vector.extract_strided_slice %40 {offsets = [0, 0, 0, 0, 0], sizes = [1, 4, 4, 1, 64], strides = [1, 1, 1, 1, 1]} : vector<1x4x4x2x64xf32> to vector<1x4x4x1x64xf32>
    %42 = vector.shape_cast %41 : vector<1x4x4x1x64xf32> to vector<1x4x4x64xf32>
    %43 = vector.extract_strided_slice %40 {offsets = [0, 0, 0, 1, 0], sizes = [1, 4, 4, 1, 64], strides = [1, 1, 1, 1, 1]} : vector<1x4x4x2x64xf32> to vector<1x4x4x1x64xf32>
    %44 = vector.shape_cast %43 : vector<1x4x4x1x64xf32> to vector<1x4x4x64xf32>
    %45 = arith.addf %42, %44 : vector<1x4x4x64xf32>
    %cst_24 = arith.constant 2.500000e-01 : f32
    %46 = vector.broadcast %cst_24 : f32 to vector<1x4x4x64xf32>
    %47 = arith.mulf %45, %46 : vector<1x4x4x64xf32>
    %48 = arith.truncf %47 : vector<1x4x4x64xf32> to vector<1x4x4x64xbf16>
    %c0_25 = arith.constant 0 : index
    %c0_26 = arith.constant 0 : index
    %c0_27 = arith.constant 0 : index
    %c0_28 = arith.constant 0 : index
    %49 = vector.load %arg5[%c0_25, %c0_26, %c0_27, %c0_28] : memref<1x4x4x64xbf16, #tpu.memory_space<vmem>>, vector<1x4x4x64xbf16>
    tpu.vector_store %arg5[%c0_25, %c0_26, %c0_27, %c0_28], %48 {strides = array<i32>} : memref<1x4x4x64xbf16, #tpu.memory_space<vmem>>, vector<1x4x4x64xbf16>,
    return
  }
  func.func @transform_0(%arg0: i32) -> (i32, i32, i32, i32) {
    %c0_i32 = arith.constant 0 : i32
    %c0_i32_0 = arith.constant 0 : i32
    %c0_i32_1 = arith.constant 0 : i32
    %c0_i32_2 = arith.constant 0 : i32
    return %arg0, %c0_i32, %c0_i32_0, %c0_i32_1 : i32, i32, i32, i32
  }
  func.func @transform_1(%arg0: i32) -> (i32, i32, i32) {
    %c0_i32 = arith.constant 0 : i32
    %c0_i32_0 = arith.constant 0 : i32
    %c0_i32_1 = arith.constant 0 : i32
    %c0_i32_2 = arith.constant 0 : i32
    return %c0_i32, %c0_i32_0, %c0_i32_1 : i32, i32, i32
  }
  func.func @transform_2(%arg0: i32) -> (i32, i32) {
    %c0_i32 = arith.constant 0 : i32
    %c0_i32_0 = arith.constant 0 : i32
    %c0_i32_1 = arith.constant 0 : i32
    return %c0_i32, %c0_i32_0 : i32, i32
  }
  func.func @transform_3(%arg0: i32) -> (i32, i32) {
    %c0_i32 = arith.constant 0 : i32
    %c0_i32_0 = arith.constant 0 : i32
    %c0_i32_1 = arith.constant 0 : i32
    return %c0_i32, %c0_i32_0 : i32, i32
  }
  func.func @transform_4(%arg0: i32) -> (i32, i32, i32, i32) {
    %c0_i32 = arith.constant 0 : i32
    %c0_i32_0 = arith.constant 0 : i32
    %c0_i32_1 = arith.constant 0 : i32
    %c0_i32_2 = arith.constant 0 : i32
    return %arg0, %c0_i32, %c0_i32_0, %c0_i32_1 : i32, i32, i32, i32
  }
}

</mosaic_0001>

<bundles_post_ra>
// kernel: tpu_custom_call.1
= control target key start
LH: loop header
LB: loop body
LE: loop exit
PB: predicated region body
PF: predicated region fallthrough
CT: control target
= control target key end

     0   :  { %9 = vsyncpa [#allocation3], 0  ;;  %s2027_s0 = inlined_call_operand.hbm [shape: bf16[2,10,8,48], index: 0, kind: input, shape index: {}]   ;;  %s2028_s1 = inlined_call_operand.hbm [shape: s8[3,48,64], index: 1, kind: input, shape index: {}]   ;;  %s2029_s2 = inlined_call_operand.vmem [shape: f32[1,64], index: 2, kind: input, shape index: {}]   ;;  %s2030_s3 = inlined_call_operand.vmem [shape: f32[1,64], index: 3, kind: input, shape index: {}]   ;;  %s2031_s4 = inlined_call_operand.hbm [shape: bf16[2,4,4,64], index: 4, kind: output, shape index: {}]  }
   0x1   :  { %11 = vsyncpa [#allocation3 + $0x1], 0 }
   0x2   :  { %12 = vsyncpa [#allocation6], 0 }
   0x3   :  { %13 = vsyncpa [#allocation4], 0 }
   0x4   :  { %15 = vsyncpa [#allocation4 + $0x1], 0  ;;  %s1699_s15 = smov 0   ;;  %s1701_s16 = smov 0  }
   0x5   :  { %s1703_s17 = smov 0   ;;  %s1705_s18 = smov 0  }
   0x6 LB: > { %s1720_s19 = sadd.s32 4294967295, %s1662_s18   ;;  %s1289_s20 = sadd.s32 4294967294, %s1662_s18   ;;  %s1662_s18 = sphi %s1705_s18, %s2051_s18   ;;  %s1658_s17 = sphi %s1703_s17, %s2050_s17   ;;  %s1654_s16 = sphi %s1701_s16, %s2049_s16   ;;  %s1650_s15 = sphi %s1699_s15, %s2048_s15  }
   0x7   : > { %p41_p0 = scmp.ne.s32.totalorder %s1654_s16, %s1650_s15  ;;  %p2032_p1 = scmp.eq.s32.totalorder %s1720_s19, 0 }
   0x8   : > { %p134_p3 = scmp.eq.s32.totalorder %s1289_s20, 1  ;;  %p1290_p5 = scmp.ge.s32.totalorder %s1662_s18, 1 }
   0x9   : > { %p1729_p4 = por %p2032_p1, %p41_p0  ;;  %p141_p7 = scmp.lt.s32.totalorder %s1662_s18, 3 }
   0xa   : > { %p1734_p6 = por %p134_p3, %p41_p0  ;;  %s1664_s24 = smov [#allocation5]  }
   0xb   : > { %s2035_s21 = scalar_select %p1729_p4, 1, 0 }
   0xc   : > { %s2036_s22 = scalar_select %p1734_p6, 1, 0 }
   0xd   : > { %p1739_p8 = pnand %p1290_p5, %p141_p7  ;;  %s153_s25 = sshll.u32 %s1664_s24, 4  ;;  %s1743_s25 = int_to_ptr.vmem [resolvable:$true] %s153_s25 }
   0xe   : > { %s1755_s27 = sadd.s32 1, %s1662_s18   ;;  %s28_s28 = sadd.s32 1, %s1658_s17 }
   0xf   : > { %s2037_s23 = scalar_select %p1739_p8, 1, 0 }
  0x10   : > { %p1466_p9 = pneg %p1739_p8  ;;  %s25_s29 = ssub.s32 %s1662_s18, %s1755_s27 }
  0x11   : > { %s1534_s6 = scalar_lea.hbm %s2028_s1, 576 }
  0x12   : > { %p1750_p11 = pnand %p1466_p9, %p2032_p1  ;;  %p1535_p12 = scmp.ne.s32.totalorder %s2028_s1, %s1534_s6 }
  0x13   : > { %p1541_p5 = scmp.lt.u32.totalorder %s1534_s6, %s2028_s1 }
  0x14   : > { %p1536_p13 = pneg %p1750_p11 }
  0x16   : > { %p1537_p0 = pnand %p1536_p13, %p1535_p12 }
  0x18   : > { %p1538_p3 = pneg %p1537_p0 }
  0x1a   : > { %p1543_p7 = pnand %p1541_p5, %p1538_p3 }
  0x1c   : > { %1546 = shalt.err (!%p1543_p7)
}
  0x1d   : > { %s1547_s11 = scalar_lea.vmem %s1743_s25, 576  ;;  %p1555_p2 = scmp.lt.s32.totalorder %s1743_s25, %s1743_s25 }
  0x1e   : > { %p1548_p9 = scmp.ne.s32.totalorder %s1743_s25, %s1547_s11  ;;  %p1556_p6 = scmp.lt.s32.totalorder %s1547_s11, %s1547_s11 }
  0x20   : > { %p1550_p10 = pnand %p1548_p9, %p1536_p13  ;;  %p1557_p4 = por %p1556_p6, %p1555_p2 }
  0x22   : > { %p1551_p1 = pneg %p1550_p10 }
  0x24   : > { %p1558_p8 = pnand %p1557_p4, %p1551_p1 }
  0x26   : > { %1561 = shalt.err (!%p1558_p8)
}
  0x27   : > { %s1665_s12 = smov 32   ;;  %s1666_s13 = smov 2  }
  0x28   : > { %1469 = dma.hbm_to_vmem [thread:$0]  (!%p1750_p11), %s2028_s1, 576, %s1743_s25, [#allocation6], %s1665_s12, %s1665_s12, %s1666_s13  }
  0x29   : > { %p26_p2 = scmp.eq.s32.totalorder %s25_s29, 0  ;;  %p35_p1 = scmp.ne.s32.totalorder %s1658_s17, %s1654_s16 }
  0x2a   : > { %p36_p4 = scmp.eq.s32.totalorder %s1662_s18, 0  ;;  %p1479_p6 = scmp.lt.s32.totalorder %s1662_s18, 2 }
  0x2b   : > { %s1786_s24 = scalar_select %p26_p2, %s1658_s17, %s28_s28  }
  0x2c   : > { %p37_p8 = por %p36_p4, %p35_p1  ;;  %p2039_p10 = scmp.eq.s32.totalorder %s1720_s19, 1 }
  0x2d   : > { %s173_s5 = sand.u32 1, %s1658_s17   ;;  %s1456_s6 = smul.u32 640, %s1662_s18 }
  0x2e   : > { %p1790_p12 = por %p2039_p10, %p35_p1  ;;  %s1455_s7 = smul.u32 40, %s173_s5 }
  0x2f   : > { %s1799_s9 = scalar_lea.hbm %s2027_s0, %s1456_s6  ;;  %p1801_p11 = pnand %p1479_p6, %p37_p8 }
  0x30   : > { %s177_s28 = scalar_lea.vmem [#allocation2], %s1455_s7  ;;  %s1807_s10 = scalar_lea.sflag [#allocation3], %s173_s5 }
  0x31   : > { %s184_s29 = sshll.u32 %s177_s28, 4  ;;  %s1562_s11 = scalar_lea.hbm %s1799_s9, 640  ;;  %s1805_s29 = int_to_ptr.vmem [resolvable:$true] %s184_s29 }
  0x32   : > { %p1563_p13 = scmp.ne.s32.totalorder %s1799_s9, %s1562_s11  ;;  %p1564_p0 = pneg %p1801_p11 }
  0x33   : > { %s1567_s14 = scalar_lea.hbm %s2027_s0, 1280  ;;  %p1568_p7 = scmp.lt.u32.totalorder %s1799_s9, %s2027_s0 }
  0x34   : > { %p1565_p3 = pnand %p1564_p0, %p1563_p13  ;;  %p1569_p9 = scmp.lt.u32.totalorder %s1567_s14, %s1562_s11 }
  0x35   : > { %p1571_p1 = scmp.lt.u32.totalorder %s1562_s11, %s1799_s9 }
  0x36   : > { %p1566_p5 = pneg %p1565_p3  ;;  %p1570_p2 = por %p1569_p9, %p1568_p7 }
  0x38   : > { %p1572_p4 = por %p1571_p1, %p1570_p2 }
  0x3a   : > { %p1573_p6 = pnand %p1572_p4, %p1566_p5 }
  0x3c   : > { %1576 = shalt.err (!%p1573_p6)
}
  0x3d   : > { %s1577_s5 = scalar_lea.vmem %s1805_s29, 640  ;;  %s1667_s7 = smov [#allocation2]  }
  0x3e   : > { %p1578_p8 = scmp.ne.s32.totalorder %s1805_s29, %s1577_s5  ;;  %s1582_s26 = sshll.u32 %s1667_s7, 4  ;;  %s1583_s26 = int_to_ptr.vmem [resolvable:$false] %s1582_s26 }
  0x3f   : > { %s1584_s8 = scalar_lea.vmem %s1583_s26, 1280  ;;  %p1585_p3 = scmp.lt.s32.totalorder %s1805_s29, %s1583_s26 }
  0x40   : > { %p1580_p10 = pnand %p1578_p8, %p1564_p0  ;;  %p1586_p7 = scmp.lt.s32.totalorder %s1584_s8, %s1577_s5 }
  0x42   : > { %p1581_p13 = pneg %p1580_p10  ;;  %p1587_p9 = por %p1586_p7, %p1585_p3 }
  0x44   : > { %p1588_p2 = pnand %p1587_p9, %p1581_p13 }
  0x46   : > { %1591 = shalt.err (!%p1588_p2)
}
  0x47   : > { %s1668_s28 = smov 64   ;;  %s1669_s11 = smov 4  }
  0x48   : > { %1473 = dma.hbm_to_vmem [thread:$0]  (!%p1801_p11), %s1799_s9, 640, %s1805_s29, %s1807_s10, %s1668_s28, %s1668_s28, %s1669_s11  }
  0x49   : > { %p2042_p0 = scmp.ne.s32.totalorder %s2037_s23, 0 }
  0x4a   : > { %s1838_s12 = sand.u32 (!%p2042_p0), 1, %s1654_s16   ;;  %p2043_p5 = scmp.ne.s32.totalorder (!%p2042_p0), %s2035_s21, 0 }
  0x4b   : > { %196 = sbr.rel (%p2042_p0) target bundleno = 406 (0x196), region = 36  ;;  %s199_s14 = scalar_lea.sflag (!%p2042_p0), [#allocation3], %s1838_s12 }
  0x4c   : > { %s1457_s13 = smul.u32 (!%p2042_p0), 40, %s1838_s12 }
  0x4e   : > { %s1842_s20 = scalar_lea.vmem (!%p2042_p0), [#allocation2], %s1457_s13 }
  0x52   : > { %1637 = dma.done.wait (%p2043_p5), %s199_s14, 640  }
  0x53   : > { %1639 = vsyncadd (%p2043_p5), %s199_s14, 4294966656  ;;  %p2044_p11 = scmp.eq.s32.totalorder %s1720_s19, 0 }
  0x55   : > { %1641 = dma.done.wait (%p2044_p11), [#allocation6], 576   ;;  %p2045_p1 = pmov %p2044_p11 }
  0x56   : > { %v262_v0 = vld [vmem:[#allocation5 + $0xc] sm:$0x3]  ;;  %v263_v1 = vld [vmem:[#allocation5 + $0xe] sm:$0x3]  ;;  %v240_v2 = vld [vmem:[#allocation5] sm:$0x3] }
  0x57   : > { %1643 = vsyncadd (%p2045_p1), [#allocation6], 4294966720  ;;  %v268_v3 = vunpack.c.l.s8.bf16 %v262_v0  ;;  %v269_v4 = vunpack.c.l.s8.bf16 %v263_v1  ;;  %v241_v5 = vld [vmem:[#allocation5 + $0x2] sm:$0x3]  ;;  %v246_v6 = vunpack.c.l.s8.bf16 %v240_v2  ;;  %v264_v7 = vld [vmem:[#allocation5 + $0x10] sm:$0x3] }
  0x58   : > { %v265_v8 = vld [vmem:[#allocation5 + $0x12] sm:$0x3]  ;;  %v247_v9 = vunpack.c.l.s8.bf16 %v241_v5  ;;  %v270_v10 = vunpack.c.l.s8.bf16 %v264_v7  ;;  %v242_v12 = vld [vmem:[#allocation5 + $0x4] sm:$0x3]  ;;  %v243_v13 = vld [vmem:[#allocation5 + $0x6] sm:$0x3] }
  0x59   : > { %v271_v11 = vunpack.c.l.s8.bf16 %v265_v8  ;;  %v266_v14 = vld [vmem:[#allocation5 + $0x14] sm:$0x3]  ;;  %v1309_v15 = vcombine.low %v268_v3, %v269_v4  ;;  %v248_v16 = vunpack.c.l.s8.bf16 %v242_v12  ;;  %v249_v17 = vunpack.c.l.s8.bf16 %v243_v13  ;;  %v267_v18 = vld [vmem:[#allocation5 + $0x16] sm:$0x3]  ;;  %v244_v20 = vld [vmem:[#allocation5 + $0x8] sm:$0x3] }
  0x5a   : > { %v272_v19 = vunpack.c.l.s8.bf16 %v266_v14  ;;  %v245_v21 = vld [vmem:[#allocation5 + $0xa] sm:$0x3]  ;;  %v1320_v22 = vcombine.low %v246_v6, %v247_v9  ;;  %v273_v24 = vunpack.c.l.s8.bf16 %v267_v18  ;;  %v250_v25 = vunpack.c.l.s8.bf16 %v244_v20  ;;  %v1522_v26 = vld [vmem:[%s1842_s20 + $0x4] sm:$0xff]   ;;  %v1528_v51 = vld [vmem:[%s1842_s20 + $0x1c] sm:$0xff]   ;;  %s1296_s29 = sshll.u32 %s1838_s12, 3  ;;  %s1369_s6 = sshll.u32 %s1720_s19, 7 }
  0x5b   : > { %v1310_v23 = vcombine.low %v270_v10, %v271_v11  ;;  %1391 = vmatprep.subr.bf16.mxu1 %v1309_v15  ;;  %v1321_v27 = vcombine.low %v248_v16, %v249_v17  ;;  %v251_v28 = vunpack.c.l.s8.bf16 %v245_v21  ;;  %vm312_vm0 = vcmask 392192   ;;  %v1523_v29 = vld [vmem:[%s1842_s20] sm:$0xff]   ;;  %v1524_v41 = vld [vmem:[%s1842_s20 + $0xc] sm:$0xff]   ;;  %v1526_v48 = vld [vmem:[%s1842_s20 + $0x14] sm:$0xff]   ;;  %s1941_s10 = scalar_lea.vmem [#allocation7], %s1296_s29  ;;  %s1978_s8 = scalar_lea.hbm %s2031_s4, %s1369_s6 }
  0x5c   : > { %1405 = vmatprep.subr.bf16.mxu0 %v1320_v22  ;;  %1392 = vmatpush3.bf16.msra.mxu1 %v1309_v15  ;;  %v1311_v30 = vcombine.low %v272_v19, %v273_v24  ;;  %v515_v32 = vld [vmem:[#allocation5 + $0x18] sm:$0x3]  ;;  %v516_v33 = vld [vmem:[#allocation5 + $0x1a] sm:$0x3]  ;;  %v517_v34 = vld [vmem:[#allocation5 + $0x1c] sm:$0x3]  ;;  %v692_v11 = vlaneseq }
  0x5d   : > { %1406 = vmatpush3.bf16.msra.mxu0 %v1320_v22  ;;  %1393 = vmatprep.subr.bf16.mxu1 %v1310_v23  ;;  %v1322_v31 = vcombine.low %v250_v25, %v251_v28  ;;  %v521_v35 = vunpack.c.l.s8.bf16 %v515_v32  ;;  %v522_v36 = vunpack.c.l.s8.bf16 %v516_v33  ;;  %v518_v37 = vld [vmem:[#allocation5 + $0x1e] sm:$0x3]  ;;  %v523_v39 = vunpack.c.l.s8.bf16 %v517_v34  ;;  %v519_v42 = vld [vmem:[#allocation5 + $0x20] sm:$0x3]  ;;  %v520_v43 = vld [vmem:[#allocation5 + $0x22] sm:$0x3] }
  0x5e   : > { %1407 = vmatprep.subr.bf16.mxu0 %v1321_v27  ;;  %1397 = vmatprep.mubr.msk.bf16.mxu1 %vm312_vm0, %v1522_v26  ;;  %v524_v40 = vunpack.c.l.s8.bf16 %v518_v37  ;;  %v1525_v44 = vld [vmem:[%s1842_s20 + $0x8] sm:$0xff]   ;;  %v525_v46 = vunpack.c.l.s8.bf16 %v519_v42  ;;  %v526_v47 = vunpack.c.l.s8.bf16 %v520_v43  ;;  %v1527_v49 = vld [vmem:[%s1842_s20 + $0x10] sm:$0xff]   ;;  %v1529_v52 = vld [vmem:[%s1842_s20 + $0x18] sm:$0xff]   ;;  %v1670_v9 = vmov 1983009808   ;;  %s1206_s5 = sshll.u32 %s1941_s10, 4  ;;  %s1980_s5 = int_to_ptr.vmem [resolvable:$true] %s1206_s5 }
  0x5f   : > { %1411 = vmatprep.mubr.msk.bf16.mxu0 %vm312_vm0, %v1523_v29  ;;  %v1339_v38 = vcombine.low %v521_v35, %v522_v36  ;;  %v1530_v53 = vld [vmem:[%s1842_s20 + $0x8] sm:$0xff]   ;;  %v1531_v54 = vld [vmem:[%s1842_s20 + $0x18] sm:$0xff]   ;;  %v1533_v55 = vld [vmem:[%s1842_s20 + $0x20] sm:$0xff]   ;;  %v690_v10 = vunpack.c.l.s4 %v1670_v9  ;;  %v693_v25 = vshrl.u32 %v692_v11, 7  ;;  %vm1125_vm1 = vcmask 1041409   ;;  %s1193_s28 = scalar_lea.sflag [#allocation4], %s1838_s12 }
  0x60   : > { %1394 = vmatpush3.bf16.msra.mxu1 %v1310_v23  ;;  %v1340_v45 = vcombine.low %v523_v39, %v524_v40  ;;  %v1341_v50 = vcombine.low %v525_v46, %v526_v47  ;;  %v1532_v56 = vld [vmem:[%s1842_s20 + $0x10] sm:$0xff]   ;;  %v1346_v12 = vld [vmem:[%s2029_s2] ss:$0 sm:$0xff]  ;;  %vm1128_vm2 = vcmask 1042434   ;;  %vm1131_vm3 = vcmask 1043459   ;;  %s1592_s19 = scalar_lea.vmem %s1980_s5, 128 }
  0x61   : > { %1408 = vmatpush3.bf16.msra.mxu0 %v1321_v27  ;;  %1395 = vmatprep.subr.bf16.mxu1 %v1311_v30  ;;  %v691_v20 = vunpack.c.0.s8 %v690_v10  ;;  %v1347_v29 = vld [vmem:[%s2030_s3] ss:$0 sm:$0xff]  ;;  %vm1187_vm4 = vcmask 517120   ;;  %p1593_p4 = scmp.ne.s32.totalorder %s1980_s5, %s1592_s19  ;;  %s1671_s11 = smov [#allocation7]  }
  0x62   : > { %1409 = vmatprep.subr.bf16.mxu0 %v1322_v31  ;;  %s1596_s13 = sshll.u32 %s1671_s11, 4  ;;  %s1597_s13 = int_to_ptr.vmem [resolvable:$false] %s1596_s13 }
  0x63   : > { %v1882_v40 = vsub.s32 %v691_v20, %v693_v25  ;;  %p1594_p6 = pnand %p1593_p4, %p1790_p12  ;;  %s1598_s14 = scalar_lea.vmem %s1597_s13, 256 }
  0x64   : > { %1396 = vmatpush3.bf16.msra.mxu1 %v1311_v30  ;;  %p1599_p10 = scmp.lt.s32.totalorder %s1980_s5, %s1597_s13  ;;  %p1600_p13 = scmp.lt.s32.totalorder %s1598_s14, %s1592_s19 }
  0x65   : > { %1410 = vmatpush3.bf16.msra.mxu0 %v1322_v31  ;;  %1433 = vmatprep.subr.bf16.mxu1 %v1339_v38  ;;  %p1595_p8 = pneg %p1594_p6 }
  0x66   : > { %1419 = vmatprep.subr.bf16.mxu0 %v1339_v38  ;;  %p1601_p3 = por %p1600_p13, %p1599_p10 }
  0x67   : > { %1398 = vmatmul.mubr.msk.bf16.vlgmr.msra.gmra.mrb[0].mxu1 %vm312_vm0, %v1524_v41 }
  0x68   : > { %1412 = vmatmul.mubr.msk.bf16.vlgmr.msra.gmra.mrb[0].mxu0 %vm312_vm0, %v1525_v44  ;;  %1436 = vmatpush3.bf16.msra.mxu1 %v1339_v38  ;;  %p1602_p7 = pnand %p1601_p3, %p1595_p8 }
  0x69   : > { %1420 = vmatpush3.bf16.msra.mxu0 %v1339_v38  ;;  %1434 = vmatprep.subr.bf16.mxu1 %v1340_v45 }
  0x6a   : > { %1421 = vmatprep.subr.bf16.mxu0 %v1340_v45  ;;  %1401 = vmatprep.mubr.msk.bf16.mxu1 %vm312_vm0, %v1526_v48 }
  0x6b   : > { %1415 = vmatprep.mubr.msk.bf16.mxu0 %vm312_vm0, %v1527_v49 }
  0x6c   : > { %1437 = vmatpush3.bf16.msra.mxu1 %v1340_v45 }
  0x6d   : > { %1422 = vmatpush3.bf16.msra.mxu0 %v1340_v45  ;;  %1435 = vmatprep.subr.bf16.mxu1 %v1341_v50 }
  0x6e   : > { %1423 = vmatprep.subr.bf16.mxu0 %v1341_v50 }
  0x6f   : > { %1402 = vmatmul.mubr.msk.bf16.gmra.mrb[4].mxu1 %vm312_vm0, %v1528_v51 }
  0x70   : > { %1416 = vmatmul.mubr.msk.bf16.gmra.mrb[4].mxu0 %vm312_vm0, %v1529_v52  ;;  %1438 = vmatpush3.bf16.msra.mxu1 %v1341_v50 }
  0x71   : > { %1424 = vmatpush3.bf16.msra.mxu0 %v1341_v50  ;;  %1425 = vmatprep.mubr.msk.bf16.mxu0 %vm312_vm0, %v1530_v53 }
  0x72   : > { %1429 = vmatprep.mubr.msk.bf16.mxu1 %vm312_vm0, %v1531_v54 }
  0x77   : > { %1430 = vmatmul.mubr.msk.bf16.vlgmr.msra.gmra.mrb[8].mxu1 %vm312_vm0, %v1533_v55 }
  0x78   : > { %1426 = vmatmul.mubr.msk.bf16.vlgmr.msra.gmra.mrb[0].mxu0 %vm312_vm0, %v1532_v56 }
 0x13a   : > { %v1399_v57 = vpop.f32.mrb[0].mxu1 }
 0x13b   : > { %v359_v58 = vpop.f32.mrb[1].mxu1 }
 0x13c   : > { %v1400_v59 = vpop.f32.mrb[2].mxu1 }
 0x13d   : > { %v362_v60 = vpop.f32.mrb[3].mxu1 }
 0x142   : > { %v1403_v61 = vpop.f32.mrb[4].mxu1 }
 0x143   : > { %v1417_v62 = vpop.f32.mrb[4].mxu0  ;;  %v375_v63 = vpop.f32.mrb[5].mxu1 }
 0x144   : > { %v499_v0 = vadd.f32 %v1417_v62, %v1403_v61  ;;  %v490_v1 = vpop.f32.mrb[5].mxu0  ;;  %v1404_v2 = vpop.f32.mrb[6].mxu1 }
 0x145   : > { %v491_v3 = vadd.f32 %v490_v1, %v375_v63  ;;  %v1418_v4 = vpop.f32.mrb[6].mxu0  ;;  %v378_v5 = vpop.f32.mrb[7].mxu1 }
 0x146   : > { %v502_v6 = vadd.f32 %v1418_v4, %v1404_v2  ;;  %v493_v7 = vpop.f32.mrb[7].mxu0 }
 0x147   : > { %v494_v8 = vadd.f32 %v493_v7, %v378_v5 }
 0x14a   : > { %v1431_v13 = vpop.f32.mrb[8].mxu1 }
 0x14b   : > { %v1427_v14 = vpop.f32.mrb[0].mxu0  ;;  %v648_v15 = vadd.f32 %v1431_v13, %v499_v0  ;;  %v627_v16 = vpop.f32.mrb[9].mxu1 }
 0x14c   : > { %v1439_v17 = vadd.f32 %v1427_v14, %v1399_v57  ;;  %v611_v18 = vpop.f32.mrb[1].mxu0  ;;  %v646_v19 = vadd.f32 %v627_v16, %v491_v3  ;;  %v1432_v21 = vpop.f32.mrb[10].mxu1 }
 0x14d   : > { %v663_v22 = vmul.f32 %v1346_v12, %v648_v15  ;;  %v1440_v23 = vadd.f32 %v611_v18, %v359_v58  ;;  %v1428_v24 = vpop.f32.mrb[2].mxu0  ;;  %v649_v26 = vadd.f32 %v1432_v21, %v502_v6  ;;  %v630_v27 = vpop.f32.mrb[11].mxu1 }
 0x14e   : > { %v659_v28 = vmul.f32 %v1439_v17, %v1346_v12  ;;  %v661_v30 = vmul.f32 %v1346_v12, %v646_v19  ;;  %v1441_v31 = vadd.f32 %v1428_v24, %v1400_v59  ;;  %v614_v32 = vpop.f32.mrb[3].mxu0  ;;  %v647_v33 = vadd.f32 %v630_v27, %v494_v8 }
 0x14f   : > { %v657_v34 = vmul.f32 %v1440_v23, %v1346_v12  ;;  %v664_v35 = vmul.f32 %v1346_v12, %v649_v26  ;;  %v1442_v36 = vadd.f32 %v614_v32, %v362_v60  ;;  %v678_v39 = vadd.f32 %v1347_v29, %v663_v22 }
 0x150   : > { %v660_v37 = vmul.f32 %v1441_v31, %v1346_v12  ;;  %v662_v38 = vmul.f32 %v1346_v12, %v647_v33  ;;  %v674_v43 = vadd.f32 %v1347_v29, %v659_v28  ;;  %v676_v44 = vadd.f32 %v1347_v29, %v661_v30 }
 0x151   : > { %v679_v41 = vadd.f32 %v1347_v29, %v664_v35  ;;  %v658_v42 = vmul.f32 %v1442_v36, %v1346_v12  ;;  %v672_v47 = vadd.f32 %v1347_v29, %v657_v34 }
 0x152   : > { %v675_v45 = vadd.f32 %v1347_v29, %v660_v37  ;;  %v677_v46 = vadd.f32 %v1347_v29, %v662_v38 }
 0x153   : > { %v683_v48 = vadd.f32 %v679_v41, %v678_v39  ;;  %v673_v49 = vadd.f32 %v1347_v29, %v658_v42 }
 0x154   : > { %v681_v50 = vadd.f32 %v675_v45, %v674_v43  ;;  %v1884_v51 = vadd.f32 %v677_v46, %v676_v44 }
 0x155   : > { %v739_v52 = vcombine.high %v683_v48, %v683_v48  ;;  %v746_v53 = vrot.slane %v683_v48, %v1882_v40  ;;  %v1887_v54 = vadd.f32 %v673_v49, %v672_v47 }
 0x156   : > { %v705_v55 = vcombine.high %v681_v50, %v681_v50  ;;  %v712_v56 = vrot.slane %v681_v50, %v1882_v40  ;;  %v722_v57 = vcombine.high %v1884_v51, %v1884_v51  ;;  %v1894_v58 = vrot.slane %v1884_v51, %v1882_v40 }
 0x157   : > { %v753_v59 = vrot.slane %v739_v52, %v1882_v40  ;;  %v754_v60 = vcombine.high %v746_v53, %v746_v53  ;;  %v1360_v61 = vrot.slane %v746_v53, 9  ;;  %v688_v62 = vcombine.high %v1887_v54, %v1887_v54 }
 0x158   : > { %v719_v63 = vrot.slane %v705_v55, %v1882_v40  ;;  %v720_v0 = vcombine.high %v712_v56, %v712_v56  ;;  %v1352_v1 = vrot.slane %v712_v56, 9  ;;  %v1902_v2 = vrot.slane %v1887_v54, %v1882_v40 }
 0x159   : > { %v755_v3 = vcombine.high %v753_v59, %v753_v59  ;;  %v1361_v4 = vrot.slane %v754_v60, 9  ;;  %v1362_v5 = vrot.slane %v753_v59, 9  ;;  %v832_v6 = vadd.f32 %v1360_v61, %v746_v53 }
 0x15a   : > { %v721_v7 = vcombine.high %v719_v63, %v719_v63  ;;  %v1353_v8 = vrot.slane %v720_v0, 9  ;;  %v1354_v9 = vrot.slane %v719_v63, 9  ;;  %v824_v10 = vadd.f32 %v1352_v1, %v712_v56 }
 0x15b   : > { %v1363_v11 = vrot.slane %v755_v3, 9  ;;  %v833_v12 = vadd.f32 %v1361_v4, %v754_v60  ;;  %v834_v13 = vadd.f32 %v1362_v5, %v753_v59  ;;  %v848_v14 = vmul.f32 0.25, %v832_v6 }
 0x15c   : > { %v1355_v15 = vrot.slane %v721_v7, 9  ;;  %v825_v16 = vadd.f32 %v1353_v8, %v720_v0  ;;  %v826_v17 = vadd.f32 %v1354_v9, %v719_v63  ;;  %v840_v18 = vmul.f32 0.25, %v824_v10 }
 0x15d   : > { %v835_v19 = vadd.f32 %v1363_v11, %v755_v3  ;;  %v849_v20 = vmul.f32 0.25, %v833_v12  ;;  %v850_v21 = vmul.f32 0.25, %v834_v13  ;;  %v864_v22 = vpack.c.bf16 %v848_v14, %v848_v14 }
 0x15e   : > { %v827_v23 = vadd.f32 %v1355_v15, %v721_v7  ;;  %v841_v24 = vmul.f32 0.25, %v825_v16  ;;  %v842_v25 = vmul.f32 0.25, %v826_v17  ;;  %v856_v26 = vpack.c.bf16 %v840_v18, %v840_v18 }
 0x15f   : > { %v851_v27 = vmul.f32 0.25, %v835_v19  ;;  %v865_v28 = vpack.c.bf16 %v849_v20, %v849_v20  ;;  %v866_v29 = vpack.c.bf16 %v850_v21, %v850_v21  ;;  %v974_v30 = vrot.slane %v864_v22, %v1882_v40 }
 0x160   : > { %v843_v31 = vmul.f32 0.25, %v827_v23  ;;  %v857_v32 = vpack.c.bf16 %v841_v24, %v841_v24  ;;  %v858_v33 = vpack.c.bf16 %v842_v25, %v842_v25  ;;  %v918_v34 = vrot.slane %v856_v26, %v1882_v40 }
 0x161   : > { %v867_v35 = vpack.c.bf16 %v851_v27, %v851_v27  ;;  %v981_v36 = vrot.slane %v865_v28, %v1882_v40  ;;  %v988_v37 = vrot.slane %v866_v29, %v1882_v40  ;;  %v1086_v38 = vrot.slane %v974_v30, %v1882_v40 }
 0x162   : > { %v859_v39 = vpack.c.bf16 %v843_v31, %v843_v31  ;;  %v925_v41 = vrot.slane %v857_v32, %v1882_v40  ;;  %v932_v42 = vrot.slane %v858_v33, %v1882_v40  ;;  %v1030_v43 = vrot.slane %v918_v34, %v1882_v40 }
 0x163   : > { %v995_v44 = vrot.slane %v867_v35, %v1882_v40  ;;  %v1093_v45 = vrot.slane %v981_v36, %v1882_v40  ;;  %v1100_v46 = vrot.slane %v988_v37, %v1882_v40  ;;  %v1120_v47 = vunpack.c.l.b16 %v1086_v38 }
 0x164   : > { %v939_v48 = vrot.slane %v859_v39, %v1882_v40  ;;  %v1037_v49 = vrot.slane %v925_v41, %v1882_v40  ;;  %v1044_v50 = vrot.slane %v932_v42, %v1882_v40  ;;  %v1112_v52 = vunpack.c.l.b16 %v1030_v43 }
 0x165   : > { %v1107_v53 = vrot.slane %v995_v44, %v1882_v40  ;;  %v1121_v54 = vunpack.c.l.b16 %v1093_v45  ;;  %v1122_v55 = vunpack.c.l.b16 %v1100_v46  ;;  %v702_v56 = vrot.slane %v688_v62, %v1882_v40 }
 0x166   : > { %v1051_v59 = vrot.slane %v939_v48, %v1882_v40  ;;  %v1113_v60 = vunpack.c.l.b16 %v1037_v49  ;;  %v1114_v61 = vunpack.c.l.b16 %v1044_v50  ;;  %v703_v63 = vcombine.high %v1902_v2, %v1902_v2 }
 0x167   : > { %v1123_v0 = vunpack.c.l.b16 %v1107_v53  ;;  %v1145_v1 = vrot.slane %v1121_v54, 7  ;;  %v1147_v3 = vrot.slane %v1122_v55, 6  ;;  %v704_v4 = vcombine.high %v702_v56, %v702_v56 }
 0x168   : > { %v1115_v5 = vunpack.c.l.b16 %v1051_v59  ;;  %v1133_v6 = vrot.slane %v1113_v60, 7  ;;  %v1135_v7 = vrot.slane %v1114_v61, 6  ;;  %v1348_v8 = vrot.slane %v1902_v2, 9 }
 0x169   : > { %v1146_v62 = vsel %vm1125_vm1, %v1145_v1, %v1120_v47  ;;  %v1149_v9 = vrot.slane %v1123_v0, 5  ;;  %v1349_v10 = vrot.slane %v703_v63, 9  ;;  %v1350_v11 = vrot.slane %v702_v56, 9 }
 0x16a   : > { %v1134_v12 = vsel %vm1125_vm1, %v1133_v6, %v1112_v52  ;;  %v1137_v13 = vrot.slane %v1115_v5, 5  ;;  %v1148_v14 = vsel %vm1128_vm2, %v1147_v3, %v1146_v62  ;;  %v1351_v15 = vrot.slane %v704_v4, 9 }
 0x16b   : > { %v1136_v16 = vsel %vm1128_vm2, %v1135_v7, %v1134_v12  ;;  %v1150_v17 = vsel %vm1131_vm3, %v1149_v9, %v1148_v14  ;;  %v820_v18 = vadd.f32 %v1348_v8, %v1902_v2  ;;  %v821_v19 = vadd.f32 %v1349_v10, %v703_v63 }
 0x16c   : > { %v1138_v20 = vsel %vm1131_vm3, %v1137_v13, %v1136_v16  ;;  %v1154_v21 = vpack.c.b16 %v1150_v17, %v1150_v17  ;;  %v822_v22 = vadd.f32 %v1350_v11, %v702_v56  ;;  %v823_v23 = vadd.f32 %v1351_v15, %v704_v4 }
 0x16d   : > { %v1152_v24 = vpack.c.b16 %v1138_v20, %v1138_v20  ;;  %v836_v25 = vmul.f32 0.25, %v820_v18  ;;  %v837_v26 = vmul.f32 0.25, %v821_v19  ;;  %v736_v27 = vrot.slane %v722_v57, %v1882_v40 }
 0x16e   : > { %v1182_v28 = vrot.slane %v1154_v21, %v1882_v40  ;;  %v838_v29 = vmul.f32 0.25, %v822_v22  ;;  %v839_v30 = vmul.f32 0.25, %v823_v23  ;;  %v737_v2 = vcombine.high %v1894_v58, %v1894_v58 }
 0x16f   : > { %v1168_v31 = vrot.slane %v1152_v24, %v1882_v40  ;;  %v852_v32 = vpack.c.bf16 %v836_v25, %v836_v25  ;;  %v853_v33 = vpack.c.bf16 %v837_v26, %v837_v26  ;;  %v738_v34 = vcombine.high %v736_v27, %v736_v27 }
 0x170   : > { %v854_v35 = vpack.c.bf16 %v838_v29, %v838_v29  ;;  %v855_v36 = vpack.c.bf16 %v839_v30, %v839_v30  ;;  %v1356_v37 = vrot.slane %v1894_v58, 9  ;;  %v1357_v38 = vrot.slane %v737_v2, 9  ;;  %1191 = vst.msk [vmem:[%s1941_s10 + $0x6] sm:$0x3] %vm1187_vm4, %v1182_v28 }
 0x171   : > { %v890_v51 = vrot.slane %v852_v32, %v1882_v40  ;;  %v897_v57 = vrot.slane %v853_v33, %v1882_v40  ;;  %v1358_v39 = vrot.slane %v736_v27, 9  ;;  %v1359_v41 = vrot.slane %v738_v34, 9  ;;  %1189 = vst.msk [vmem:[%s1941_s10 + $0x2] sm:$0x3] %vm1187_vm4, %v1168_v31 }
 0x172   : > { %v904_v42 = vrot.slane %v854_v35, %v1882_v40  ;;  %v911_v43 = vrot.slane %v855_v36, %v1882_v40  ;;  %v828_v44 = vadd.f32 %v1356_v37, %v1894_v58  ;;  %v829_v45 = vadd.f32 %v1357_v38, %v737_v2 }
 0x173   : > { %v1002_v46 = vrot.slane %v890_v51, %v1882_v40  ;;  %v1009_v47 = vrot.slane %v897_v57, %v1882_v40  ;;  %v830_v48 = vadd.f32 %v1358_v39, %v736_v27  ;;  %v831_v49 = vadd.f32 %v1359_v41, %v738_v34 }
 0x174   : > { %v1016_v50 = vrot.slane %v904_v42, %v1882_v40  ;;  %v1023_v52 = vrot.slane %v911_v43, %v1882_v40  ;;  %v844_v53 = vmul.f32 0.25, %v828_v44  ;;  %v845_v54 = vmul.f32 0.25, %v829_v45 }
 0x175   : > { %v1109_v55 = vunpack.c.l.b16 %v1009_v47  ;;  %v846_v56 = vmul.f32 0.25, %v830_v48  ;;  %v847_v59 = vmul.f32 0.25, %v831_v49  ;;  %v1108_v0 = vunpack.c.l.b16 %v1002_v46 }
 0x176   : > { %v1110_v60 = vunpack.c.l.b16 %v1016_v50  ;;  %v1111_v61 = vunpack.c.l.b16 %v1023_v52  ;;  %v860_v63 = vpack.c.bf16 %v844_v53, %v844_v53  ;;  %v861_v58 = vpack.c.bf16 %v845_v54, %v845_v54 }
 0x177   : > { %v1124_v1 = vrot.slane %v1109_v55, 7  ;;  %v862_v3 = vpack.c.bf16 %v846_v56, %v846_v56  ;;  %v863_v4 = vpack.c.bf16 %v847_v59, %v847_v59 }
 0x178   : > { %v1127_v5 = vrot.slane %v1110_v60, 6  ;;  %v1130_v6 = vrot.slane %v1111_v61, 5  ;;  %v946_v7 = vrot.slane %v860_v63, %v1882_v40  ;;  %v953_v8 = vrot.slane %v861_v58, %v1882_v40 }
 0x179   : > { %v1126_v62 = vsel %vm1125_vm1, %v1124_v1, %v1108_v0  ;;  %v960_v9 = vrot.slane %v862_v3, %v1882_v40  ;;  %v967_v10 = vrot.slane %v863_v4, %v1882_v40 }
 0x17a   : > { %v1129_v11 = vsel %vm1128_vm2, %v1127_v5, %v1126_v62  ;;  %v1058_v12 = vrot.slane %v946_v7, %v1882_v40  ;;  %v1065_v13 = vrot.slane %v953_v8, %v1882_v40 }
 0x17b   : > { %v1132_v14 = vsel %vm1131_vm3, %v1130_v6, %v1129_v11  ;;  %v1072_v15 = vrot.slane %v960_v9, %v1882_v40  ;;  %v1079_v16 = vrot.slane %v967_v10, %v1882_v40 }
 0x17c   : > { %v1151_v17 = vpack.c.b16 %v1132_v14, %v1132_v14  ;;  %v1117_v18 = vunpack.c.l.b16 %v1065_v13  ;;  %v1116_v22 = vunpack.c.l.b16 %v1058_v12 }
 0x17d   : > { %v1118_v19 = vunpack.c.l.b16 %v1072_v15  ;;  %v1119_v20 = vunpack.c.l.b16 %v1079_v16 }
 0x17e   : > { %v1161_v21 = vrot.slane %v1151_v17, %v1882_v40  ;;  %v1139_v23 = vrot.slane %v1117_v18, 7 }
 0x17f   : > { %v1141_v24 = vrot.slane %v1118_v19, 6  ;;  %v1143_v25 = vrot.slane %v1119_v20, 5 }
 0x180   : > { %v1140_v26 = vsel %vm1125_vm1, %v1139_v23, %v1116_v22  ;;  %1188 = vst.msk [vmem:[%s1941_s10] sm:$0x3] %vm1187_vm4, %v1161_v21 }
 0x181   : > { %v1142_v27 = vsel %vm1128_vm2, %v1141_v24, %v1140_v26 }
 0x182   : > { %v1144_v28 = vsel %vm1131_vm3, %v1143_v25, %v1142_v27 }
 0x183   : > { %v1153_v29 = vpack.c.b16 %v1144_v28, %v1144_v28 }
 0x185   : > { %v1175_v30 = vrot.slane %v1153_v29, %v1882_v40 }
 0x187   : > { %1190 = vst.msk [vmem:[%s1941_s10 + $0x4] sm:$0x3] %vm1187_vm4, %v1175_v30 }
 0x188   : > { %1605 = shalt.err (!%p1602_p7)
}
 0x189   : > { %s1606_s20 = scalar_lea.hbm %s1978_s8, 128  ;;  %s1610_s9 = scalar_lea.hbm %s2031_s4, 256 }
 0x18a   : > { %p1607_p9 = scmp.ne.s32.totalorder %s1978_s8, %s1606_s20  ;;  %p1611_p5 = scmp.lt.u32.totalorder %s1978_s8, %s2031_s4 }
 0x18b   : > { %p1612_p11 = scmp.lt.u32.totalorder %s1610_s9, %s1606_s20  ;;  %p1614_p4 = scmp.lt.u32.totalorder %s1606_s20, %s1978_s8 }
 0x18c   : > { %p1608_p2 = pnand %p1607_p9, %p1790_p12 }
 0x18d   : > { %p1613_p1 = por %p1612_p11, %p1611_p5 }
 0x18e   : > { %p1609_p0 = pneg %p1608_p2 }
 0x18f   : > { %p1615_p6 = por %p1614_p4, %p1613_p1 }
 0x191   : > { %p1616_p8 = pnand %p1615_p6, %p1609_p0 }
 0x193   : > { %1619 = shalt.err (!%p1616_p8)
}
 0x194   : > { %s1672_s10 = smov 32   ;;  %s1673_s6 = smov 2  }
 0x195   : > { %1464 = dma.vmem_to_hbm [thread:$0]  (%p1790_p12), %s1980_s5, 128, %s1978_s8, %s1193_s28, %s1672_s10, %s1672_s10, %s1673_s6  }
 0x196 PF: > { %s1221_s7 = sand.u32 1, %s1650_s15   ;;  %p2046_p10 = scmp.ne.s32.totalorder %s2036_s22, 0 }
 0x197   : > { %p2047_p13 = scmp.ge.s32.totalorder %s1662_s18, 2  ;;  %s1222_s26 = scalar_lea.sflag [#allocation4], %s1221_s7 }
 0x199   : > { %p1475_p3 = pnand %p2047_p13, %p2046_p10 }
 0x19b   : > { %1645 = dma.done.wait (!%p1475_p3), %s1222_s26, 128  }
 0x19c   : > { %1647 = vsyncadd (!%p1475_p3), %s1222_s26, 4294967168  ;;  %p18_p7 = scmp.ge.s32.totalorder %s1755_s27, 4   ;;  %s2048_s15 = smov %s1654_s16 }
 0x19d   : > { %s2049_s16 = smov %s1658_s17  ;;  %s2050_s17 = smov %s1786_s24 }
 0x19e   : > { %s2051_s18 = smov %s1755_s27  ;;  %20 = sbr.rel (!%p18_p7) target bundleno = 6 (0x6), region = 89 }
 0x1a5   :  { %1227 = vsyncpa [#allocation3], 1 }
 0x1a6   :  { %1229 = vsyncpa [#allocation3 + $0x1], 1 }
 0x1a7   :  { %1230 = vsyncpa [#allocation6], 1 }
 0x1a8   :  { %1231 = vsyncpa [#allocation4], 1 }
 0x1a9   :  { %1233 = vsyncpa [#allocation4 + $0x1], 1 }

</bundles_post_ra>
